<compile_context>
chip_gen: v5e
topology: v5e:2x2
jax: 0.10.0
libtpu: 0.0.40
codegen_flags: <defaults>
</compile_context>

<pallas_src>
import functools

import jax
import jax.numpy as jnp
from jax.experimental import pallas as pl
from jax.experimental.pallas import tpu as pltpu


def _round_up(x, m):
    return ((x + m - 1) // m) * m


def weightnet_kernel(x_ref, w_ref, b_ref, o_ref, *, d_in):
    """x_ref: (tile, d_in) f32; w_ref: (3, H, H) compute dtype (slot 0 holds
    w1.T in its first d_in rows, slot 2 holds w3.T in its first d_out cols);
    b_ref: (8, H) f32 (rows 0..2 = b1, b2, b3-zero-padded); o_ref: (tile, H)."""
    dt = w_ref.dtype  # MXU input dtype (bf16 or f32)

    x = x_ref[...].astype(dt)                                   # cast in-kernel
    # fc1 + ReLU   (f32 accumulate, f32 epilogue)
    h1 = jnp.dot(x, w_ref[0, :d_in, :], preferred_element_type=jnp.float32)
    h1 = jnp.maximum(h1 + b_ref[0:1, :], 0.0).astype(dt)
    # fc2 + ReLU
    h2 = jnp.dot(h1, w_ref[1], preferred_element_type=jnp.float32)
    h2 = jnp.maximum(h2 + b_ref[1:2, :], 0.0).astype(dt)
    # fc3 + Sigmoid   (lane-dense: full-H store; padded lanes sliced off outside)
    h3 = jnp.dot(h2, w_ref[2], preferred_element_type=jnp.float32)
    o_ref[...] = jax.nn.sigmoid(h3 + b_ref[2:3, :]).astype(o_ref.dtype)


def prepare_params(params, compute_dtype=jnp.bfloat16):
    """One-time conversion of PyTorch-layout params (w: (out, in), b: (out,))
    into kernel layout: a single (3, H, H) transposed/zero-padded weight block
    (cast to the MXU compute dtype) and a single (8, H) f32 bias block."""
    d_in = params["w1"].shape[1]
    hidden = params["w1"].shape[0]
    d_out = params["w3"].shape[0]
    assert hidden % 128 == 0 and d_in <= hidden and d_out <= hidden
    H = hidden

    w = jnp.zeros((3, H, H), compute_dtype)
    w = w.at[0, :d_in, :].set(params["w1"].T.astype(compute_dtype))
    w = w.at[1].set(params["w2"].T.astype(compute_dtype))
    w = w.at[2, :, :d_out].set(params["w3"].T.astype(compute_dtype))

    b = jnp.zeros((8, H), jnp.float32)          # 8 sublanes (rows 0-2 real)
    b = b.at[0].set(params["b1"].astype(jnp.float32))
    b = b.at[1].set(params["b2"].astype(jnp.float32))
    b = b.at[2, :d_out].set(params["b3"].astype(jnp.float32))

    return {"w": w, "b": b, "d_in": d_in, "d_out": d_out, "hidden": H,
            "compute_dtype": compute_dtype}


def weightnet_forward(x, prep, num_cores=2, max_tile=512):
    """x: (B, d_in) float32. prep: output of prepare_params (kernel layout).
    Returns (B, d_out) in the compute dtype."""
    d_in, d_out, H = prep["d_in"], prep["d_out"], prep["hidden"]
    dt = prep["compute_dtype"]
    B = x.shape[0]
    assert x.shape[1] == d_in

    # Tile selection: aim for `num_cores` grid steps (keeps both v7x TCs busy,
    # costs ~0.35us extra per step on single-TC chips), multiple of 8 rows,
    # capped so very large batches still pipeline.
    b8 = _round_up(max(B, 1), 8)
    tile = min(max_tile, _round_up(-(-b8 // num_cores), 8))
    b_pad = _round_up(b8, tile)
    if b_pad != B:
        x = jnp.pad(x, ((0, b_pad - B), (0, 0)))   # rows only; no-op when aligned

    itemsize = lambda a: a.size * a.dtype.itemsize
    cost = pl.CostEstimate(
        flops=2 * b_pad * (d_in * H + H * H + H * H),
        transcendentals=b_pad * H,
        bytes_accessed=(itemsize(x) + itemsize(prep["w"]) + itemsize(prep["b"])
                        + b_pad * H * jnp.dtype(dt).itemsize),
    )

    out = pl.pallas_call(
        functools.partial(weightnet_kernel, d_in=d_in),
        out_shape=jax.ShapeDtypeStruct((b_pad, H), dt),
        grid=(b_pad // tile,),
        in_specs=[
            pl.BlockSpec((tile, d_in), lambda i: (i, 0)),        # x: tiled batch
            pl.BlockSpec(prep["w"].shape, lambda i: (0, 0, 0)),  # weights: resident
            pl.BlockSpec(prep["b"].shape, lambda i: (0, 0)),     # biases:  resident
        ],
        out_specs=pl.BlockSpec((tile, H), lambda i: (i, 0)),     # lane-dense store
        compiler_params=pltpu.CompilerParams(
            dimension_semantics=("parallel",)),                  # 2 TCs on v7x
        cost_estimate=cost,
    )(x, prep["w"], prep["b"])

    return out[:B, :d_out]


def init_params(key, d_in, hidden, d_out):
    """Deterministic PyTorch-Linear-style init: U(-1/sqrt(fan_in), 1/sqrt(fan_in)).
    Layout matches nn.Linear: w is (out, in), b is (out,)."""
    ks = jax.random.split(key, 6)
    def lin(kw, kb, fan_in, fan_out):
        bound = 1.0 / jnp.sqrt(fan_in)
        w = jax.random.uniform(kw, (fan_out, fan_in), jnp.float32, -bound, bound)
        b = jax.random.uniform(kb, (fan_out,), jnp.float32, -bound, bound)
        return w, b
    w1, b1 = lin(ks[0], ks[1], d_in, hidden)
    w2, b2 = lin(ks[2], ks[3], hidden, hidden)
    w3, b3 = lin(ks[4], ks[5], hidden, d_out)
    return {"w1": w1, "b1": b1, "w2": w2, "b2": b2, "w3": w3, "b3": b3}


if __name__ == "__main__":
    key = jax.random.PRNGKey(0)
    k_params, k_x = jax.random.split(key)

    batch = 256        # batch of states (2 x 128-row grid steps)
    d_in = 32          # current_state.shape[1] (flattened sensor dims)
    hidden = 128       # hidden_size
    d_out = 16         # weights.shape[1] (number of sensor weights)

    torch_params = init_params(k_params, d_in, hidden, d_out)
    x = jax.random.normal(k_x, (batch, d_in), jnp.float32)

    # pure-JAX reference (PyTorch semantics: x @ W.T + b)
    def ref(x, p):
        h = jnp.maximum(x @ p["w1"].T + p["b1"], 0.0)
        h = jnp.maximum(h @ p["w2"].T + p["b2"], 0.0)
        return jax.nn.sigmoid(h @ p["w3"].T + p["b3"])
    expected = ref(x, torch_params)

    # f32 compute path — exact check
    prep_f32 = prepare_params(torch_params, compute_dtype=jnp.float32)
    out_f32 = weightnet_forward(x, prep_f32)
    jax.block_until_ready(out_f32)
    assert out_f32.shape == (batch, d_out)
    assert jnp.allclose(out_f32, expected, atol=1e-5), "f32 mismatch vs reference"

    # bf16 compute path (default; MXU-native on all generations), f32 accumulate
    prep_bf16 = prepare_params(torch_params)
    out_bf16 = weightnet_forward(x, prep_bf16)
    jax.block_until_ready(out_bf16)
    assert out_bf16.shape == (batch, d_out)
    assert jnp.allclose(out_bf16.astype(jnp.float32), expected, atol=2e-2), \
        "bf16 mismatch vs reference"

    # non-tile-aligned batch exercises the (cheap) row-pad path
    out_small = weightnet_forward(x[:100], prep_f32)
    jax.block_until_ready(out_small)
    assert out_small.shape == (100, d_out)
    assert jnp.allclose(out_small, expected[:100], atol=1e-5), "padded-batch mismatch"

    print("KERNEL_OK")
</pallas_src>

<mosaic_0001>
module attributes {stable_mosaic.version = 11 : i64} {
  func.func @weightnet_kernel(%arg0: i32, %arg1: memref<128x32xf32, #tpu.memory_space<vmem>>, %arg2: memref<3x128x128xf32, #tpu.memory_space<vmem>>, %arg3: memref<8x128xf32, #tpu.memory_space<vmem>>, %arg4: memref<128x128xf32, #tpu.memory_space<vmem>>) attributes {dimension_semantics = [#tpu.dimension_semantics<parallel>], iteration_bounds = array<i64: 2>, scalar_prefetch = 0 : i64, scratch_operands = 0 : i64, tpu.core_type = #tpu.core_type<tc>, window_params = [{transform_indices = @transform_0, window_bounds = array<i64: 128, 32>}, {pipeline_mode = #tpu.pipeline_mode<synchronous>, transform_indices = @transform_1, window_bounds = array<i64: 3, 128, 128>}, {pipeline_mode = #tpu.pipeline_mode<synchronous>, transform_indices = @transform_2, window_bounds = array<i64: 8, 128>}, {transform_indices = @transform_3, window_bounds = array<i64: 128, 128>}]} {
    %c0 = arith.constant 0 : index
    %c0_0 = arith.constant 0 : index
    %0 = vector.load %arg1[%c0, %c0_0] : memref<128x32xf32, #tpu.memory_space<vmem>>, vector<128x32xf32>
    %c0_1 = arith.constant 0 : index
    %c0_2 = arith.constant 0 : index
    %c0_3 = arith.constant 0 : index
    %1 = vector.load %arg2[%c0_1, %c0_2, %c0_3] : memref<3x128x128xf32, #tpu.memory_space<vmem>>, vector<1x32x128xf32>
    %2 = vector.shape_cast %1 : vector<1x32x128xf32> to vector<32x128xf32>
    %cst = arith.constant dense<0.000000e+00> : vector<128x128xf32>
    %3 = tpu.matmul %0, %2, %cst {dimension_numbers = #tpu.dot_dimension_numbers<[1], [0], [0], [1], [0, 0, 1, 1], [], []>} : vector<128x32xf32>, vector<32x128xf32>, vector<128x128xf32> -> vector<128x128xf32>
    %c0_4 = arith.constant 0 : index
    %c0_5 = arith.constant 0 : index
    %4 = vector.load %arg3[%c0_4, %c0_5] : memref<8x128xf32, #tpu.memory_space<vmem>>, vector<1x128xf32>
    %5 = vector.broadcast %4 : vector<1x128xf32> to vector<128x128xf32>
    %6 = arith.addf %3, %5 : vector<128x128xf32>
    %cst_6 = arith.constant 0.000000e+00 : f32
    %7 = vector.broadcast %cst_6 : f32 to vector<128x128xf32>
    %8 = arith.maximumf %6, %7 : vector<128x128xf32>
    %c1 = arith.constant 1 : index
    %c0_7 = arith.constant 0 : index
    %c0_8 = arith.constant 0 : index
    %9 = vector.load %arg2[%c1, %c0_7, %c0_8] : memref<3x128x128xf32, #tpu.memory_space<vmem>>, vector<1x128x128xf32>
    %10 = vector.shape_cast %9 : vector<1x128x128xf32> to vector<128x128xf32>
    %cst_9 = arith.constant dense<0.000000e+00> : vector<128x128xf32>
    %11 = tpu.matmul %8, %10, %cst_9 {dimension_numbers = #tpu.dot_dimension_numbers<[1], [0], [0], [1], [0, 0, 1, 1], [], []>} : vector<128x128xf32>, vector<128x128xf32>, vector<128x128xf32> -> vector<128x128xf32>
    %c1_10 = arith.constant 1 : index
    %c0_11 = arith.constant 0 : index
    %12 = vector.load %arg3[%c1_10, %c0_11] : memref<8x128xf32, #tpu.memory_space<vmem>>, vector<1x128xf32>
    %13 = vector.broadcast %12 : vector<1x128xf32> to vector<128x128xf32>
    %14 = arith.addf %11, %13 : vector<128x128xf32>
    %cst_12 = arith.constant 0.000000e+00 : f32
    %15 = vector.broadcast %cst_12 : f32 to vector<128x128xf32>
    %16 = arith.maximumf %14, %15 : vector<128x128xf32>
    %c2 = arith.constant 2 : index
    %c0_13 = arith.constant 0 : index
    %c0_14 = arith.constant 0 : index
    %17 = vector.load %arg2[%c2, %c0_13, %c0_14] : memref<3x128x128xf32, #tpu.memory_space<vmem>>, vector<1x128x128xf32>
    %18 = vector.shape_cast %17 : vector<1x128x128xf32> to vector<128x128xf32>
    %cst_15 = arith.constant dense<0.000000e+00> : vector<128x128xf32>
    %19 = tpu.matmul %16, %18, %cst_15 {dimension_numbers = #tpu.dot_dimension_numbers<[1], [0], [0], [1], [0, 0, 1, 1], [], []>} : vector<128x128xf32>, vector<128x128xf32>, vector<128x128xf32> -> vector<128x128xf32>
    %c2_16 = arith.constant 2 : index
    %c0_17 = arith.constant 0 : index
    %20 = vector.load %arg3[%c2_16, %c0_17] : memref<8x128xf32, #tpu.memory_space<vmem>>, vector<1x128xf32>
    %21 = vector.broadcast %20 : vector<1x128xf32> to vector<128x128xf32>
    %22 = arith.addf %19, %21 : vector<128x128xf32>
    %23 = arith.negf %22 : vector<128x128xf32>
    %24 = math.exp %23 : vector<128x128xf32>
    %cst_18 = arith.constant 1.000000e+00 : f32
    %25 = vector.broadcast %cst_18 : f32 to vector<128x128xf32>
    %26 = arith.addf %25, %24 : vector<128x128xf32>
    %27 = arith.divf %25, %26 : vector<128x128xf32>
    %c0_19 = arith.constant 0 : index
    %c0_20 = arith.constant 0 : index
    %28 = vector.load %arg4[%c0_19, %c0_20] : memref<128x128xf32, #tpu.memory_space<vmem>>, vector<128x128xf32>
    tpu.vector_store %arg4[%c0_19, %c0_20], %27 {strides = array<i32>} : memref<128x128xf32, #tpu.memory_space<vmem>>, vector<128x128xf32>,
    return
  }
  func.func @transform_0(%arg0: i32) -> (i32, i32) {
    %c0_i32 = arith.constant 0 : i32
    %c0_i32_0 = arith.constant 0 : i32
    return %arg0, %c0_i32 : i32, i32
  }
  func.func @transform_1(%arg0: i32) -> (i32, i32, i32) {
    %c0_i32 = arith.constant 0 : i32
    %c0_i32_0 = arith.constant 0 : i32
    %c0_i32_1 = arith.constant 0 : i32
    %c0_i32_2 = arith.constant 0 : i32
    return %c0_i32, %c0_i32_0, %c0_i32_1 : i32, i32, i32
  }
  func.func @transform_2(%arg0: i32) -> (i32, i32) {
    %c0_i32 = arith.constant 0 : i32
    %c0_i32_0 = arith.constant 0 : i32
    %c0_i32_1 = arith.constant 0 : i32
    return %c0_i32, %c0_i32_0 : i32, i32
  }
  func.func @transform_3(%arg0: i32) -> (i32, i32) {
    %c0_i32 = arith.constant 0 : i32
    %c0_i32_0 = arith.constant 0 : i32
    return %arg0, %c0_i32 : i32, i32
  }
}

</mosaic_0001>

<bundles_post_ra>
// kernel: tpu_custom_call.1
= control target key start
LH: loop header
LB: loop body
LE: loop exit
PB: predicated region body
PF: predicated region fallthrough
CT: control target
= control target key end

     0   :  { %8 = vsyncpa [#allocation3], 0  ;;  %s1454_s0 = inlined_call_operand.vmem [shape: f32[256,32], index: 0, kind: input, shape index: {}]   ;;  %s1455_s1 = inlined_call_operand.hbm [shape: f32[3,128,128], index: 1, kind: input, shape index: {}]   ;;  %s1456_s2 = inlined_call_operand.vmem [shape: f32[8,128], index: 2, kind: input, shape index: {}]   ;;  %s1457_s3 = inlined_call_operand.hbm [shape: f32[256,128], index: 3, kind: output, shape index: {}]  }
   0x1   :  { %9 = vsyncpa [#allocation4], 0 }
   0x2   :  { %11 = vsyncpa [#allocation4 + $0x1], 0  ;;  %s1258_s12 = smov 0   ;;  %s1260_s13 = smov 0  }
   0x3   :  { %s1262_s14 = smov 0   ;;  %s1264_s15 = smov 0  }
   0x4 LB: > { %s1279_s16 = sadd.s32 4294967295, %s1231_s15   ;;  %s935_s17 = sadd.s32 4294967294, %s1231_s15   ;;  %s1231_s15 = sphi %s1264_s15, %s1463_s15   ;;  %s1227_s14 = sphi %s1262_s14, %s1462_s14   ;;  %s1223_s13 = sphi %s1260_s13, %s1461_s13   ;;  %s1219_s12 = sphi %s1258_s12, %s1460_s12  }
   0x5   : > { %s1283_s18 = sadd.s32 1, %s1231_s15   ;;  %s92_s19 = sadd.s32 1, %s1227_s14 }
   0x6   : > { %s89_s20 = ssub.s32 %s1231_s15, %s1283_s18  ;;  %p102_p0 = scmp.ne.s32.totalorder %s1227_s14, %s1223_s13 }
   0x7   : > { %p90_p1 = scmp.eq.s32.totalorder %s89_s20, 0  ;;  %p103_p2 = scmp.eq.s32.totalorder %s1279_s16, 1 }
   0x8   : > { %p108_p3 = scmp.ne.s32.totalorder %s1223_s13, %s1219_s12  ;;  %p109_p4 = scmp.eq.s32.totalorder %s935_s17, 1 }
   0x9   : > { %s1294_s21 = scalar_select %p90_p1, %s1227_s14, %s92_s19  }
   0xa   : > { %p1296_p5 = por %p103_p2, %p102_p0  ;;  %p1300_p6 = por %p109_p4, %p108_p3 }
   0xb   : > { %p936_p7 = scmp.ge.s32.totalorder %s1231_s15, 1  ;;  %p116_p8 = scmp.lt.s32.totalorder %s1231_s15, 3 }
   0xc   : > { %p1028_p9 = scmp.eq.s32.totalorder %s1279_s16, 0  ;;  %s127_s26 = sshll.u32 %s1455_s1, 4  ;;  %s128_s26 = int_to_ptr.hbm [resolvable:$true] %s127_s26 }
   0xd   : > { %p117_p10 = pnand %p936_p7, %p116_p8  ;;  %s1233_s27 = smov [#allocation2]  }
   0xe   : > { %s129_s28 = sshll.u32 %s1233_s27, 4  ;;  %s1234_s29 = smov 128   ;;  %s130_s28 = int_to_ptr.vmem [resolvable:$true] %s129_s28 }
   0xf   : > { %p1020_p11 = pneg %p117_p10  ;;  %s1235_s30 = smov 8  }
  0x10   : > { %157 = sbr.rel (%p117_p10) target bundleno = 582 (0x246), region = 32 }
  0x11   : > { %p1021_p12 = pnand %p1028_p9, %p1020_p11 }
  0x13   : > { %1023 = dma.hbm_to_vmem [thread:$0]  (!%p1021_p12), %s128_s26, 6144, %s130_s28, [#allocation3], %s1234_s29, %s1234_s29, %s1235_s30  }
  0x15   : > { %1210 = dma.done.wait (%p1028_p9), [#allocation3], 6144  }
  0x16   : > { %1212 = vsyncadd (%p1028_p9), [#allocation3], 4294961152  ;;  %s942_s4 = sshll.u32 %s1279_s16, 4  ;;  %v208_v0 = vld [vmem:[#allocation2 + $0x18] sm:$0xff]  ;;  %v207_v1 = vld [vmem:[#allocation2 + $0x10] sm:$0xff]  ;;  %vm211_vm0 = vcmask 261120  }
  0x17   : > { %p183_p13 = scmp.lt.s32.totalorder %s942_s4, 31  ;;  %272 = vmatpush.msra.mxu0 %v208_v0  ;;  %v206_v2 = vld [vmem:[#allocation2 + $0x8] sm:$0xff]  ;;  %v205_v3 = vld [vmem:[#allocation2] sm:$0xff]  ;;  %v357_v13 = vld [vmem:[#allocation2 + $0xf8] sm:$0xff]  ;;  %s179_s24 = sand.u32 1, %s1223_s13  }
  0x18   : > { %v356_v14 = vld [vmem:[#allocation2 + $0xf0] sm:$0xff]  ;;  %360 = vmatpush.msra.mxu1 %v357_v13  ;;  %982 = vmatpush.msra.mxu3 %v357_v13  ;;  %v355_v15 = vld [vmem:[#allocation2 + $0xe8] sm:$0xff]  ;;  %v354_v17 = vld [vmem:[#allocation2 + $0xe0] sm:$0xff]  ;;  %s941_s25 = sshll.u32 %s179_s24, 7  ;;  %s981_s27 = sshll.u32 %s1279_s16, 7 }
  0x19   : > { %s1465_s4 = smov (!%p183_p13, %s942_s4), 31  ;;  %273 = vmatpush.msra.mxu0 %v207_v1  ;;  %v353_v18 = vld [vmem:[#allocation2 + $0xd8] sm:$0xff]  ;;  %v352_v19 = vld [vmem:[#allocation2 + $0xd0] sm:$0xff]  ;;  %v351_v20 = vld [vmem:[#allocation2 + $0xc8] sm:$0xff]  ;;  %s1390_s26 = scalar_lea.vmem [#allocation5], %s941_s25 }
  0x1a   : > { %s943_s5 = sshll.u32 %s1465_s4, 3  ;;  %361 = vmatpush.msra.mxu1 %v356_v14  ;;  %983 = vmatpush.msra.mxu3 %v356_v14  ;;  %v350_v22 = vld [vmem:[#allocation2 + $0xc0] sm:$0xff]  ;;  %v349_v23 = vld [vmem:[#allocation2 + $0xb8] sm:$0xff]  ;;  %v348_v24 = vld [vmem:[#allocation2 + $0xb0] sm:$0xff]  ;;  %s857_s30 = scalar_lea.hbm %s1457_s3, %s981_s27 }
  0x1b   : > { %s1320_s8 = scalar_lea.vmem %s1454_s0, %s943_s5  ;;  %274 = vmatpush.msra.mxu0 %v206_v2  ;;  %v347_v25 = vld [vmem:[#allocation2 + $0xa8] sm:$0xff]  ;;  %v346_v27 = vld [vmem:[#allocation2 + $0xa0] sm:$0xff]  ;;  %v345_v28 = vld [vmem:[#allocation2 + $0x98] sm:$0xff]  ;;  %s858_s16 = sshll.u32 %s1390_s26, 4  ;;  %s859_s16 = int_to_ptr.vmem [resolvable:$true] %s858_s16 }
  0x1c   : > { %v189_v4 = vld [vmem:[%s1320_s8] sm:$0xff]  ;;  %v190_v5 = vld [vmem:[%s1320_s8 + $0x8] sm:$0xff]  ;;  %v191_v6 = vld [vmem:[%s1320_s8 + $0x10] sm:$0xff]  ;;  %362 = vmatpush.msra.mxu1 %v355_v15  ;;  %984 = vmatpush.msra.mxu3 %v355_v15  ;;  %s860_s4 = sshll.u32 %s857_s30, 4  ;;  %s846_s5 = scalar_lea.sflag [#allocation4], %s179_s24  ;;  %s861_s4 = int_to_ptr.hbm [resolvable:$true] %s860_s4 }
  0x1d   : > { %275 = vmatpush.msra.mxu0 %v205_v3  ;;  %v192_v7 = vld [vmem:[%s1320_s8 + $0x18] sm:$0xff]  ;;  %v193_v8 = vld [vmem:[%s1320_s8 + $0x20] sm:$0xff]  ;;  %v194_v9 = vld [vmem:[%s1320_s8 + $0x28] sm:$0xff]  ;;  %s1179_s6 = sshra.s32 %s861_s4, 4  ;;  %s1185_s10 = scalar_lea.hbm %s1457_s3, 256  ;;  %s1180_s6 = int_to_ptr.hbm [resolvable:$true] %s1179_s6 }
  0x1e   : > { %944 = vmatmul.msk.f32.vlgmr.msra.gmra.mxu0 %vm211_vm0, %v189_v4  ;;  %v195_v10 = vld [vmem:[%s1320_s8 + $0x30] sm:$0xff]  ;;  %v196_v11 = vld [vmem:[%s1320_s8 + $0x38] sm:$0xff]  ;;  %v197_v12 = vld [vmem:[%s1320_s8 + $0x40] sm:$0xff]  ;;  %363 = vmatpush.msra.mxu1 %v354_v17  ;;  %s1181_s7 = scalar_lea.hbm %s1180_s6, 128  ;;  %p1186_p3 = scmp.lt.s32.totalorder %s1180_s6, %s1457_s3 }
  0x1f   : > { %v198_v16 = vld [vmem:[%s1320_s8 + $0x48] sm:$0xff]  ;;  %985 = vmatpush.msra.mxu3 %v354_v17  ;;  %v199_v21 = vld [vmem:[%s1320_s8 + $0x50] sm:$0xff]  ;;  %v200_v26 = vld [vmem:[%s1320_s8 + $0x58] sm:$0xff]  ;;  %p1182_p0 = scmp.ne.s32.totalorder %s1180_s6, %s1181_s7  ;;  %p1187_p4 = scmp.lt.s32.totalorder %s1185_s10, %s1181_s7 }
  0x20   : > { %364 = vmatpush.msra.mxu1 %v353_v18  ;;  %v344_v29 = vld [vmem:[#allocation2 + $0x90] sm:$0xff]  ;;  %v201_v30 = vld [vmem:[%s1320_s8 + $0x60] sm:$0xff]  ;;  %v343_v31 = vld [vmem:[#allocation2 + $0x88] sm:$0xff] }
  0x21   : > { %986 = vmatpush.msra.mxu3 %v353_v18  ;;  %v342_v32 = vld [vmem:[#allocation2 + $0x80] sm:$0xff]  ;;  %v202_v33 = vld [vmem:[%s1320_s8 + $0x68] sm:$0xff]  ;;  %v203_v34 = vld [vmem:[%s1320_s8 + $0x70] sm:$0xff]  ;;  %p1183_p1 = pnand %p1182_p0, %p1296_p5  ;;  %p1188_p7 = por %p1187_p4, %p1186_p3 }
  0x22   : > { %365 = vmatpush.msra.mxu1 %v352_v19  ;;  %v204_v35 = vld [vmem:[%s1320_s8 + $0x78] sm:$0xff]  ;;  %v1357_v36 = vld [vmem:[%s1456_s2] ss:$0 sm:$0xff]  ;;  %v456_v3 = vld [vmem:[#allocation2 + $0x170] sm:$0xff] }
  0x23   : > { %987 = vmatpush.msra.mxu3 %v352_v19  ;;  %v457_v0 = vld [vmem:[#allocation2 + $0x178] sm:$0xff]  ;;  %v450_v13 = vld [vmem:[#allocation2 + $0x140] sm:$0xff]  ;;  %v448_v17 = vld [vmem:[#allocation2 + $0x130] sm:$0xff]  ;;  %p1184_p2 = pneg %p1183_p1 }
  0x24   : > { %366 = vmatpush.msra.mxu1 %v351_v20  ;;  %460 = vmatpush.msra.mxu2 %v457_v0  ;;  %v449_v14 = vld [vmem:[#allocation2 + $0x138] sm:$0xff]  ;;  %v447_v19 = vld [vmem:[#allocation2 + $0x128] sm:$0xff] }
  0x25   : > { %988 = vmatpush.msra.mxu3 %v351_v20  ;;  %v446_v20 = vld [vmem:[#allocation2 + $0x120] sm:$0xff]  ;;  %p1189_p8 = pnand %p1188_p7, %p1184_p2 }
  0x26   : > { %945 = vmatmul.msk.f32.gmra.mxu0 %vm211_vm0, %v190_v5  ;;  %367 = vmatpush.msra.mxu1 %v350_v22  ;;  %v455_v5 = vld [vmem:[#allocation2 + $0x168] sm:$0xff] }
  0x27   : > { %989 = vmatpush.msra.mxu3 %v350_v22  ;;  %461 = vmatpush.msra.mxu2 %v456_v3 }
  0x28   : > { %368 = vmatpush.msra.mxu1 %v349_v23 }
  0x29   : > { %990 = vmatpush.msra.mxu3 %v349_v23  ;;  %462 = vmatpush.msra.mxu2 %v455_v5 }
  0x2a   : > { %369 = vmatpush.msra.mxu1 %v348_v24 }
  0x2b   : > { %991 = vmatpush.msra.mxu3 %v348_v24  ;;  %v444_v24 = vld [vmem:[#allocation2 + $0x110] sm:$0xff] }
  0x2c   : > { %370 = vmatpush.msra.mxu1 %v347_v25 }
  0x2d   : > { %992 = vmatpush.msra.mxu3 %v347_v25 }
  0x2e   : > { %946 = vmatmul.msk.f32.gmra.mxu0 %vm211_vm0, %v191_v6  ;;  %371 = vmatpush.msra.mxu1 %v346_v27  ;;  %v454_v6 = vld [vmem:[#allocation2 + $0x160] sm:$0xff] }
  0x2f   : > { %993 = vmatpush.msra.mxu3 %v346_v27  ;;  %463 = vmatpush.msra.mxu2 %v454_v6  ;;  %v442_v27 = vld [vmem:[#allocation2 + $0x100] sm:$0xff] }
  0x30   : > { %372 = vmatpush.msra.mxu1 %v345_v28 }
  0x31   : > { %994 = vmatpush.msra.mxu3 %v345_v28 }
  0x32   : > { %373 = vmatpush.msra.mxu1 %v344_v29 }
  0x33   : > { %995 = vmatpush.msra.mxu3 %v344_v29 }
  0x34   : > { %374 = vmatpush.msra.mxu1 %v343_v31 }
  0x35   : > { %996 = vmatpush.msra.mxu3 %v343_v31 }
  0x36   : > { %947 = vmatmul.msk.f32.gmra.mxu0 %vm211_vm0, %v192_v7  ;;  %375 = vmatpush.msra.mxu1 %v342_v32  ;;  %v453_v7 = vld [vmem:[#allocation2 + $0x158] sm:$0xff] }
  0x37   : > { %997 = vmatpush.msra.mxu3 %v342_v32  ;;  %464 = vmatpush.msra.mxu2 %v453_v7 }
  0x39   : > { %998 = vmatpush.msrb.mxu3 %v457_v0 }
  0x3b   : > { %999 = vmatpush.msrb.mxu3 %v456_v3 }
  0x3d   : > { %1000 = vmatpush.msrb.mxu3 %v455_v5 }
  0x3e   : > { %948 = vmatmul.msk.f32.gmra.mxu0 %vm211_vm0, %v193_v8 }
  0x3f   : > { %1001 = vmatpush.msrb.mxu3 %v454_v6 }
  0x41   : > { %1002 = vmatpush.msrb.mxu3 %v453_v7 }
  0x46   : > { %949 = vmatmul.msk.f32.gmra.mxu0 %vm211_vm0, %v194_v9 }
  0x4e   : > { %950 = vmatmul.msk.f32.gmra.mxu0 %vm211_vm0, %v195_v10  ;;  %v452_v10 = vld [vmem:[#allocation2 + $0x150] sm:$0xff] }
  0x4f   : > { %465 = vmatpush.msra.mxu2 %v452_v10  ;;  %1003 = vmatpush.msrb.mxu3 %v452_v10 }
  0x56   : > { %951 = vmatmul.msk.f32.gmra.mxu0 %vm211_vm0, %v196_v11 }
  0x5e   : > { %952 = vmatmul.msk.f32.gmra.mxu0 %vm211_vm0, %v197_v12  ;;  %v451_v12 = vld [vmem:[#allocation2 + $0x148] sm:$0xff] }
  0x5f   : > { %466 = vmatpush.msra.mxu2 %v451_v12  ;;  %1004 = vmatpush.msrb.mxu3 %v451_v12 }
  0x61   : > { %467 = vmatpush.msra.mxu2 %v450_v13  ;;  %1005 = vmatpush.msrb.mxu3 %v450_v13 }
  0x63   : > { %468 = vmatpush.msra.mxu2 %v449_v14  ;;  %1006 = vmatpush.msrb.mxu3 %v449_v14 }
  0x65   : > { %469 = vmatpush.msra.mxu2 %v448_v17  ;;  %1007 = vmatpush.msrb.mxu3 %v448_v17 }
  0x66   : > { %953 = vmatmul.msk.f32.gmra.mxu0 %vm211_vm0, %v198_v16 }
  0x67   : > { %470 = vmatpush.msra.mxu2 %v447_v19  ;;  %1008 = vmatpush.msrb.mxu3 %v447_v19 }
  0x69   : > { %471 = vmatpush.msra.mxu2 %v446_v20  ;;  %1009 = vmatpush.msrb.mxu3 %v446_v20 }
  0x6e   : > { %954 = vmatmul.msk.f32.gmra.mxu0 %vm211_vm0, %v199_v21  ;;  %v445_v21 = vld [vmem:[#allocation2 + $0x118] sm:$0xff] }
  0x6f   : > { %472 = vmatpush.msra.mxu2 %v445_v21  ;;  %1010 = vmatpush.msrb.mxu3 %v445_v21 }
  0x71   : > { %473 = vmatpush.msra.mxu2 %v444_v24  ;;  %1011 = vmatpush.msrb.mxu3 %v444_v24 }
  0x76   : > { %955 = vmatmul.msk.f32.gmra.mxu0 %vm211_vm0, %v200_v26  ;;  %v443_v26 = vld [vmem:[#allocation2 + $0x108] sm:$0xff] }
  0x77   : > { %474 = vmatpush.msra.mxu2 %v443_v26  ;;  %1012 = vmatpush.msrb.mxu3 %v443_v26 }
  0x79   : > { %475 = vmatpush.msra.mxu2 %v442_v27  ;;  %1013 = vmatpush.msrb.mxu3 %v442_v27 }
  0x7e   : > { %956 = vmatmul.msk.f32.gmra.mxu0 %vm211_vm0, %v201_v30 }
  0x86   : > { %957 = vmatmul.msk.f32.gmra.mxu0 %vm211_vm0, %v202_v33 }
  0x8e   : > { %958 = vmatmul.msk.f32.gmra.mxu0 %vm211_vm0, %v203_v34 }
  0x96   : > { %959 = vmatmul.msk.f32.gmra.mxu0 %vm211_vm0, %v204_v35 }
  0x9b   : > { %v277_v37 = vpop.f32.mrf.mxu0 }
  0x9c   : > { %v278_v38 = vadd.f32 %v1357_v36, %v277_v37 }
  0x9e   : > { %v325_v39 = vmax.f32 %v278_v38, 0.0  ;;  %v1069_v38 = vld [vmem:[%s1456_s2 + $0x1] ss:$0 sm:$0xff] }
  0xa0   : > { %376 = vmatmul.f32.vlgmr.msra.gmra.mxu1 %v325_v39 }
  0xa3   : > { %v280_v40 = vpop.f32.mrf.mxu0 }
  0xa4   : > { %v281_v41 = vadd.f32 %v1357_v36, %v280_v40 }
  0xa6   : > { %v326_v42 = vmax.f32 %v281_v41, 0.0 }
  0xa8   : > { %379 = vmatmul.f32.gmra.mxu1 %v326_v42 }
  0xab   : > { %v283_v43 = vpop.f32.mrf.mxu0 }
  0xac   : > { %v284_v44 = vadd.f32 %v1357_v36, %v283_v43 }
  0xae   : > { %v327_v45 = vmax.f32 %v284_v44, 0.0 }
  0xb0   : > { %382 = vmatmul.f32.gmra.mxu1 %v327_v45 }
  0xb3   : > { %v286_v46 = vpop.f32.mrf.mxu0 }
  0xb4   : > { %v287_v47 = vadd.f32 %v1357_v36, %v286_v46 }
  0xb6   : > { %v328_v48 = vmax.f32 %v287_v47, 0.0 }
  0xb8   : > { %385 = vmatmul.f32.gmra.mxu1 %v328_v48 }
  0xbb   : > { %v289_v49 = vpop.f32.mrf.mxu0 }
  0xbc   : > { %v290_v50 = vadd.f32 %v1357_v36, %v289_v49 }
  0xbe   : > { %v329_v51 = vmax.f32 %v290_v50, 0.0 }
  0xc0   : > { %388 = vmatmul.f32.gmra.mxu1 %v329_v51 }
  0xc3   : > { %v292_v52 = vpop.f32.mrf.mxu0 }
  0xc4   : > { %v293_v53 = vadd.f32 %v1357_v36, %v292_v52 }
  0xc6   : > { %v330_v54 = vmax.f32 %v293_v53, 0.0 }
  0xc8   : > { %391 = vmatmul.f32.gmra.mxu1 %v330_v54 }
  0xcb   : > { %v295_v55 = vpop.f32.mrf.mxu0 }
  0xcc   : > { %v296_v56 = vadd.f32 %v1357_v36, %v295_v55 }
  0xce   : > { %v331_v57 = vmax.f32 %v296_v56, 0.0 }
  0xd0   : > { %394 = vmatmul.f32.gmra.mxu1 %v331_v57 }
  0xd3   : > { %v298_v58 = vpop.f32.mrf.mxu0 }
  0xd4   : > { %v299_v59 = vadd.f32 %v1357_v36, %v298_v58 }
  0xd6   : > { %v332_v60 = vmax.f32 %v299_v59, 0.0 }
  0xd8   : > { %397 = vmatmul.f32.gmra.mxu1 %v332_v60 }
  0xdb   : > { %v301_v61 = vpop.f32.mrf.mxu0 }
  0xdc   : > { %v302_v62 = vadd.f32 %v1357_v36, %v301_v61 }
  0xde   : > { %v333_v63 = vmax.f32 %v302_v62, 0.0 }
  0xe0   : > { %400 = vmatmul.f32.gmra.mxu1 %v333_v63 }
  0xe3   : > { %v304_v1 = vpop.f32.mrf.mxu0 }
  0xe4   : > { %v305_v2 = vadd.f32 %v1357_v36, %v304_v1 }
  0xe6   : > { %v334_v4 = vmax.f32 %v305_v2, 0.0 }
  0xe8   : > { %403 = vmatmul.f32.gmra.mxu1 %v334_v4 }
  0xeb   : > { %v307_v8 = vpop.f32.mrf.mxu0 }
  0xec   : > { %v308_v9 = vadd.f32 %v1357_v36, %v307_v8 }
  0xee   : > { %v335_v11 = vmax.f32 %v308_v9, 0.0 }
  0xf0   : > { %406 = vmatmul.f32.gmra.mxu1 %v335_v11 }
  0xf3   : > { %v310_v15 = vpop.f32.mrf.mxu0 }
  0xf4   : > { %v311_v16 = vadd.f32 %v1357_v36, %v310_v15 }
  0xf6   : > { %v336_v18 = vmax.f32 %v311_v16, 0.0 }
  0xf8   : > { %409 = vmatmul.f32.gmra.mxu1 %v336_v18 }
  0xfb   : > { %v313_v22 = vpop.f32.mrf.mxu0 }
  0xfc   : > { %v314_v23 = vadd.f32 %v1357_v36, %v313_v22  ;;  %v1381_v22 = vld [vmem:[%s1456_s2 + $0x2] ss:$0 sm:$0xff] }
  0xfe   : > { %v337_v25 = vmax.f32 %v314_v23, 0.0 }
 0x100   : > { %412 = vmatmul.f32.vlgmr.msra.gmra.mxu3 %v337_v25 }
 0x103   : > { %v316_v28 = vpop.f32.mrf.mxu0 }
 0x104   : > { %v317_v29 = vadd.f32 %v1357_v36, %v316_v28 }
 0x106   : > { %v338_v30 = vmax.f32 %v317_v29, 0.0 }
 0x108   : > { %415 = vmatmul.f32.gmra.mxu3 %v338_v30 }
 0x10b   : > { %v319_v31 = vpop.f32.mrf.mxu0 }
 0x10c   : > { %v320_v32 = vadd.f32 %v1357_v36, %v319_v31 }
 0x10e   : > { %v339_v33 = vmax.f32 %v320_v32, 0.0 }
 0x110   : > { %418 = vmatmul.f32.gmra.mxu3 %v339_v33 }
 0x113   : > { %v322_v34 = vpop.f32.mrf.mxu0 }
 0x114   : > { %v323_v35 = vadd.f32 %v1357_v36, %v322_v34 }
 0x116   : > { %v340_v37 = vmax.f32 %v323_v35, 0.0 }
 0x118   : > { %421 = vmatmul.f32.gmra.mxu3 %v340_v37 }
 0x11d   : > { %v377_v39 = vpop.f32.mrf.mxu1 }
 0x11e   : > { %v378_v40 = vadd.f32 %v1069_v38, %v377_v39 }
 0x120   : > { %v425_v41 = vmax.f32 %v378_v40, 0.0 }
 0x122   : > { %476 = vmatmul.f32.vlgmr.msra.gmra.mxu2 %v425_v41 }
 0x125   : > { %v380_v42 = vpop.f32.mrf.mxu1 }
 0x126   : > { %v381_v43 = vadd.f32 %v1069_v38, %v380_v42 }
 0x128   : > { %v426_v44 = vmax.f32 %v381_v43, 0.0 }
 0x12a   : > { %479 = vmatmul.f32.gmra.mxu2 %v426_v44 }
 0x12d   : > { %v383_v45 = vpop.f32.mrf.mxu1 }
 0x12e   : > { %v384_v46 = vadd.f32 %v1069_v38, %v383_v45 }
 0x130   : > { %v427_v47 = vmax.f32 %v384_v46, 0.0 }
 0x132   : > { %482 = vmatmul.f32.gmra.mxu2 %v427_v47 }
 0x135   : > { %v386_v48 = vpop.f32.mrf.mxu1 }
 0x136   : > { %v387_v36 = vadd.f32 %v1069_v38, %v386_v48 }
 0x138   : > { %v428_v49 = vmax.f32 %v387_v36, 0.0 }
 0x13a   : > { %485 = vmatmul.f32.gmra.mxu2 %v428_v49 }
 0x13d   : > { %v389_v50 = vpop.f32.mrf.mxu1 }
 0x13e   : > { %v390_v51 = vadd.f32 %v1069_v38, %v389_v50 }
 0x140   : > { %v429_v52 = vmax.f32 %v390_v51, 0.0 }
 0x142   : > { %488 = vmatmul.f32.gmra.mxu2 %v429_v52 }
 0x145   : > { %v392_v53 = vpop.f32.mrf.mxu1 }
 0x146   : > { %v393_v54 = vadd.f32 %v1069_v38, %v392_v53 }
 0x148   : > { %v430_v55 = vmax.f32 %v393_v54, 0.0 }
 0x14a   : > { %491 = vmatmul.f32.gmra.mxu2 %v430_v55 }
 0x14d   : > { %v395_v56 = vpop.f32.mrf.mxu1 }
 0x14e   : > { %v396_v57 = vadd.f32 %v1069_v38, %v395_v56 }
 0x150   : > { %v431_v58 = vmax.f32 %v396_v57, 0.0 }
 0x152   : > { %494 = vmatmul.f32.gmra.mxu2 %v431_v58 }
 0x155   : > { %v398_v59 = vpop.f32.mrf.mxu1 }
 0x156   : > { %v399_v60 = vadd.f32 %v1069_v38, %v398_v59 }
 0x158   : > { %v432_v61 = vmax.f32 %v399_v60, 0.0 }
 0x15a   : > { %497 = vmatmul.f32.gmra.mxu2 %v432_v61 }
 0x15d   : > { %v401_v62 = vpop.f32.mrf.mxu1 }
 0x15e   : > { %v402_v63 = vadd.f32 %v1069_v38, %v401_v62 }
 0x160   : > { %v433_v0 = vmax.f32 %v402_v63, 0.0 }
 0x162   : > { %500 = vmatmul.f32.gmra.mxu2 %v433_v0 }
 0x165   : > { %v404_v1 = vpop.f32.mrf.mxu1 }
 0x166   : > { %v405_v2 = vadd.f32 %v1069_v38, %v404_v1 }
 0x168   : > { %v434_v3 = vmax.f32 %v405_v2, 0.0 }
 0x16a   : > { %503 = vmatmul.f32.gmra.mxu2 %v434_v3 }
 0x16d   : > { %v407_v4 = vpop.f32.mrf.mxu1 }
 0x16e   : > { %v408_v5 = vadd.f32 %v1069_v38, %v407_v4 }
 0x170   : > { %v435_v6 = vmax.f32 %v408_v5, 0.0 }
 0x172   : > { %506 = vmatmul.f32.gmra.mxu2 %v435_v6 }
 0x175   : > { %v410_v7 = vpop.f32.mrf.mxu1 }
 0x176   : > { %v411_v8 = vadd.f32 %v1069_v38, %v410_v7 }
 0x178   : > { %v436_v9 = vmax.f32 %v411_v8, 0.0 }
 0x17a   : > { %509 = vmatmul.f32.gmra.mxu2 %v436_v9 }
 0x183   : > { %v413_v10 = vpop.f32.mrf.mxu3 }
 0x184   : > { %v414_v11 = vadd.f32 %v1069_v38, %v413_v10 }
 0x186   : > { %v437_v12 = vmax.f32 %v414_v11, 0.0 }
 0x188   : > { %512 = vmatmul.f32.vlgmr.msrb.gmra.mxu3 %v437_v12 }
 0x18b   : > { %v416_v13 = vpop.f32.mrf.mxu3 }
 0x18c   : > { %v417_v14 = vadd.f32 %v1069_v38, %v416_v13 }
 0x18e   : > { %v438_v15 = vmax.f32 %v417_v14, 0.0 }
 0x190   : > { %515 = vmatmul.f32.gmra.mxu3 %v438_v15 }
 0x193   : > { %v419_v16 = vpop.f32.mrf.mxu3 }
 0x194   : > { %v420_v17 = vadd.f32 %v1069_v38, %v419_v16 }
 0x196   : > { %v439_v18 = vmax.f32 %v420_v17, 0.0 }
 0x198   : > { %518 = vmatmul.f32.gmra.mxu3 %v439_v18 }
 0x19b   : > { %v422_v19 = vpop.f32.mrf.mxu3 }
 0x19c   : > { %v423_v20 = vadd.f32 %v1069_v38, %v422_v19 }
 0x19e   : > { %v440_v21 = vmax.f32 %v423_v20, 0.0 }
 0x1a0   : > { %521 = vmatmul.f32.gmra.mxu3 %v440_v21 }
 0x1a5   : > { %v477_v23 = vpop.f32.mrf.mxu2 }
 0x1a6   : > { %v478_v24 = vadd.f32 %v1381_v22, %v477_v23 }
 0x1a8   : > { %v960_v25 = vmul.f32 -1.442695, %v478_v24 }
 0x1aa   : > { %1071 = vpow2.f32 %v960_v25 }
 0x1ad   : > { %v480_v26 = vpop.f32.mrf.mxu2 }
 0x1ae   : > { %v481_v27 = vadd.f32 %v1381_v22, %v480_v26 }
 0x1b0   : > { %v1072_v28 = vpop.eup %1071  ;;  %v961_v29 = vmul.f32 -1.442695, %v481_v27 }
 0x1b1   : > { %v573_v30 = vadd.f32 1.0, %v1072_v28 }
 0x1b2   : > { %1073 = vpow2.f32 %v961_v29 }
 0x1b3   : > { %1075 = vrcp.f32 %v573_v30  ;;  %v600_v40 = vand.u32 2147483648, %v573_v30  ;;  %v598_v43 = vand.u32 2147483647, %v573_v30  ;;  %vm594_vm2 = vweird.f32 %v573_v30 }
 0x1b5   : > { %v483_v31 = vpop.f32.mrf.mxu2  ;;  %v601_v36 = vor.u32 1.1754944e-38, %v600_v40  ;;  %vm599_vm4 = vcmp.eq.f32.partialorder %v598_v43, 8.507059e+37 }
 0x1b6   : > { %v484_v32 = vadd.f32 %v1381_v22, %v483_v31 }
 0x1b8   : > { %v1074_v33 = vpop.eup %1073  ;;  %v962_v34 = vmul.f32 -1.442695, %v484_v32 }
 0x1b9   : > { %v1076_v35 = vpop.eup %1075  ;;  %v574_v37 = vadd.f32 1.0, %v1074_v33 }
 0x1ba   : > { %v590_v38 = vmul.f32 %v1076_v35, %v573_v30  ;;  %1077 = vpow2.f32 %v962_v34  ;;  %vm595_vm1 = vweird.f32 %v1076_v35 }
 0x1bb   : > { %1079 = vrcp.f32 %v574_v37  ;;  %vm596_vm3 = vmor %vm594_vm2, %vm595_vm1  ;;  %v615_v54 = vand.u32 2147483648, %v574_v37  ;;  %v613_v57 = vand.u32 2147483647, %v574_v37  ;;  %vm609_vm6 = vweird.f32 %v574_v37 }
 0x1bc   : > { %v591_v39 = vsub.f32 1.0, %v590_v38 }
 0x1bd   : > { %v486_v41 = vpop.f32.mrf.mxu2  ;;  %v616_v63 = vor.u32 1.1754944e-38, %v615_v54  ;;  %vm614_vm8 = vcmp.eq.f32.partialorder %v613_v57, 8.507059e+37 }
 0x1be   : > { %v592_v42 = vmul.f32 %v1076_v35, %v591_v39  ;;  %v487_v44 = vadd.f32 %v1381_v22, %v486_v41 }
 0x1c0   : > { %v1078_v45 = vpop.eup %1077  ;;  %v593_v46 = vadd.f32 %v1076_v35, %v592_v42  ;;  %v963_v47 = vmul.f32 -1.442695, %v487_v44 }
 0x1c1   : > { %v1080_v48 = vpop.eup %1079  ;;  %v575_v49 = vadd.f32 1.0, %v1078_v45 }
 0x1c2   : > { %v597_v50 = vsel %vm596_vm3, %v1076_v35, %v593_v46  ;;  %v605_v51 = vmul.f32 %v1080_v48, %v574_v37  ;;  %1081 = vpow2.f32 %v963_v47  ;;  %vm610_vm5 = vweird.f32 %v1080_v48 }
 0x1c3   : > { %v602_v52 = vsel %vm599_vm4, %v601_v36, %v597_v50  ;;  %1083 = vrcp.f32 %v575_v49  ;;  %vm611_vm7 = vmor %vm609_vm6, %vm610_vm5  ;;  %v630_v5 = vand.u32 2147483648, %v575_v49  ;;  %v628_v8 = vand.u32 2147483647, %v575_v49 }
 0x1c4   : > { %829 = vst [vmem:[%s1390_s26] sm:$0xff] %v602_v52  ;;  %v606_v53 = vsub.f32 1.0, %v605_v51  ;;  %vm624_vm10 = vweird.f32 %v575_v49 }
 0x1c5   : > { %v489_v55 = vpop.f32.mrf.mxu2  ;;  %v631_v14 = vor.u32 1.1754944e-38, %v630_v5  ;;  %vm629_vm12 = vcmp.eq.f32.partialorder %v628_v8, 8.507059e+37 }
 0x1c6   : > { %v607_v56 = vmul.f32 %v1080_v48, %v606_v53  ;;  %v490_v58 = vadd.f32 %v1381_v22, %v489_v55 }
 0x1c8   : > { %v1082_v59 = vpop.eup %1081  ;;  %v608_v60 = vadd.f32 %v1080_v48, %v607_v56  ;;  %v964_v61 = vmul.f32 -1.442695, %v490_v58 }
 0x1c9   : > { %v1084_v62 = vpop.eup %1083  ;;  %v576_v0 = vadd.f32 1.0, %v1082_v59 }
 0x1ca   : > { %v612_v1 = vsel %vm611_vm7, %v1080_v48, %v608_v60  ;;  %v620_v2 = vmul.f32 %v1084_v62, %v575_v49  ;;  %1085 = vpow2.f32 %v964_v61  ;;  %vm625_vm9 = vweird.f32 %v1084_v62 }
 0x1cb   : > { %v617_v3 = vsel %vm614_vm8, %v616_v63, %v612_v1  ;;  %1087 = vrcp.f32 %v576_v0  ;;  %vm626_vm11 = vmor %vm624_vm10, %vm625_vm9  ;;  %v645_v20 = vand.u32 2147483648, %v576_v0  ;;  %v643_v24 = vand.u32 2147483647, %v576_v0 }
 0x1cc   : > { %830 = vst [vmem:[%s1390_s26 + $0x8] sm:$0xff] %v617_v3  ;;  %v621_v4 = vsub.f32 1.0, %v620_v2  ;;  %vm639_vm14 = vweird.f32 %v576_v0 }
 0x1cd   : > { %v492_v6 = vpop.f32.mrf.mxu2  ;;  %v646_v30 = vor.u32 1.1754944e-38, %v645_v20  ;;  %vm644_vm0 = vcmp.eq.f32.partialorder %v643_v24, 8.507059e+37 }
 0x1ce   : > { %v622_v7 = vmul.f32 %v1084_v62, %v621_v4  ;;  %v493_v9 = vadd.f32 %v1381_v22, %v492_v6 }
 0x1d0   : > { %v1086_v10 = vpop.eup %1085  ;;  %v623_v11 = vadd.f32 %v1084_v62, %v622_v7  ;;  %v965_v12 = vmul.f32 -1.442695, %v493_v9 }
 0x1d1   : > { %v1088_v13 = vpop.eup %1087  ;;  %v577_v15 = vadd.f32 1.0, %v1086_v10 }
 0x1d2   : > { %v627_v16 = vsel %vm626_vm11, %v1084_v62, %v623_v11  ;;  %v635_v17 = vmul.f32 %v1088_v13, %v576_v0  ;;  %1089 = vpow2.f32 %v965_v12  ;;  %vm640_vm13 = vweird.f32 %v1088_v13 }
 0x1d3   : > { %v632_v18 = vsel %vm629_vm12, %v631_v14, %v627_v16  ;;  %1091 = vrcp.f32 %v577_v15  ;;  %vm641_vm15 = vmor %vm639_vm14, %vm640_vm13  ;;  %v660_v37 = vand.u32 2147483648, %v577_v15  ;;  %v658_v40 = vand.u32 2147483647, %v577_v15 }
 0x1d4   : > { %831 = vst [vmem:[%s1390_s26 + $0x10] sm:$0xff] %v632_v18  ;;  %v636_v19 = vsub.f32 1.0, %v635_v17  ;;  %vm654_vm2 = vweird.f32 %v577_v15 }
 0x1d5   : > { %v495_v21 = vpop.f32.mrf.mxu2  ;;  %v661_v46 = vor.u32 1.1754944e-38, %v660_v37  ;;  %vm659_vm4 = vcmp.eq.f32.partialorder %v658_v40, 8.507059e+37 }
 0x1d6   : > { %v637_v23 = vmul.f32 %v1088_v13, %v636_v19  ;;  %v496_v25 = vadd.f32 %v1381_v22, %v495_v21 }
 0x1d8   : > { %v1090_v26 = vpop.eup %1089  ;;  %v638_v27 = vadd.f32 %v1088_v13, %v637_v23  ;;  %v966_v28 = vmul.f32 -1.442695, %v496_v25 }
 0x1d9   : > { %v1092_v29 = vpop.eup %1091  ;;  %v578_v31 = vadd.f32 1.0, %v1090_v26 }
 0x1da   : > { %v642_v32 = vsel %vm641_vm15, %v1088_v13, %v638_v27  ;;  %v650_v33 = vmul.f32 %v1092_v29, %v577_v15  ;;  %1093 = vpow2.f32 %v966_v28  ;;  %vm655_vm1 = vweird.f32 %v1092_v29 }
 0x1db   : > { %v647_v34 = vsel %vm644_vm0, %v646_v30, %v642_v32  ;;  %1095 = vrcp.f32 %v578_v31  ;;  %vm656_vm3 = vmor %vm654_vm2, %vm655_vm1  ;;  %v675_v51 = vand.u32 2147483648, %v578_v31  ;;  %v673_v54 = vand.u32 2147483647, %v578_v31 }
 0x1dc   : > { %832 = vst [vmem:[%s1390_s26 + $0x18] sm:$0xff] %v647_v34  ;;  %v651_v35 = vsub.f32 1.0, %v650_v33  ;;  %vm669_vm6 = vweird.f32 %v578_v31 }
 0x1dd   : > { %v498_v38 = vpop.f32.mrf.mxu2  ;;  %v676_v60 = vor.u32 1.1754944e-38, %v675_v51  ;;  %vm674_vm8 = vcmp.eq.f32.partialorder %v673_v54, 8.507059e+37 }
 0x1de   : > { %v652_v39 = vmul.f32 %v1092_v29, %v651_v35  ;;  %v499_v41 = vadd.f32 %v1381_v22, %v498_v38 }
 0x1e0   : > { %v1094_v42 = vpop.eup %1093  ;;  %v653_v43 = vadd.f32 %v1092_v29, %v652_v39  ;;  %v967_v44 = vmul.f32 -1.442695, %v499_v41 }
 0x1e1   : > { %v1096_v45 = vpop.eup %1095  ;;  %v579_v47 = vadd.f32 1.0, %v1094_v42 }
 0x1e2   : > { %v657_v48 = vsel %vm656_vm3, %v1092_v29, %v653_v43  ;;  %v665_v36 = vmul.f32 %v1096_v45, %v578_v31  ;;  %1097 = vpow2.f32 %v967_v44  ;;  %vm670_vm5 = vweird.f32 %v1096_v45 }
 0x1e3   : > { %v662_v49 = vsel %vm659_vm4, %v661_v46, %v657_v48  ;;  %1099 = vrcp.f32 %v579_v47  ;;  %vm671_vm7 = vmor %vm669_vm6, %vm670_vm5  ;;  %v690_v2 = vand.u32 2147483648, %v579_v47  ;;  %v688_v5 = vand.u32 2147483647, %v579_v47 }
 0x1e4   : > { %833 = vst [vmem:[%s1390_s26 + $0x20] sm:$0xff] %v662_v49  ;;  %v666_v50 = vsub.f32 1.0, %v665_v36  ;;  %vm684_vm10 = vweird.f32 %v579_v47 }
 0x1e5   : > { %v501_v52 = vpop.f32.mrf.mxu2  ;;  %v691_v11 = vor.u32 1.1754944e-38, %v690_v2  ;;  %vm689_vm12 = vcmp.eq.f32.partialorder %v688_v5, 8.507059e+37 }
 0x1e6   : > { %v667_v53 = vmul.f32 %v1096_v45, %v666_v50  ;;  %v502_v55 = vadd.f32 %v1381_v22, %v501_v52 }
 0x1e8   : > { %v1098_v56 = vpop.eup %1097  ;;  %v668_v57 = vadd.f32 %v1096_v45, %v667_v53  ;;  %v968_v58 = vmul.f32 -1.442695, %v502_v55 }
 0x1e9   : > { %v1100_v59 = vpop.eup %1099  ;;  %v580_v61 = vadd.f32 1.0, %v1098_v56 }
 0x1ea   : > { %v672_v62 = vsel %vm671_vm7, %v1096_v45, %v668_v57  ;;  %v680_v63 = vmul.f32 %v1100_v59, %v579_v47  ;;  %1101 = vpow2.f32 %v968_v58  ;;  %vm685_vm9 = vweird.f32 %v1100_v59 }
 0x1eb   : > { %v677_v0 = vsel %vm674_vm8, %v676_v60, %v672_v62  ;;  %1103 = vrcp.f32 %v580_v61  ;;  %vm686_vm11 = vmor %vm684_vm10, %vm685_vm9  ;;  %v705_v17 = vand.u32 2147483648, %v580_v61  ;;  %v703_v20 = vand.u32 2147483647, %v580_v61 }
 0x1ec   : > { %834 = vst [vmem:[%s1390_s26 + $0x28] sm:$0xff] %v677_v0  ;;  %v681_v1 = vsub.f32 1.0, %v680_v63  ;;  %vm699_vm14 = vweird.f32 %v580_v61 }
 0x1ed   : > { %v504_v3 = vpop.f32.mrf.mxu2  ;;  %v706_v27 = vor.u32 1.1754944e-38, %v705_v17  ;;  %vm704_vm0 = vcmp.eq.f32.partialorder %v703_v20, 8.507059e+37 }
 0x1ee   : > { %v682_v4 = vmul.f32 %v1100_v59, %v681_v1  ;;  %v505_v6 = vadd.f32 %v1381_v22, %v504_v3 }
 0x1f0   : > { %v1102_v7 = vpop.eup %1101  ;;  %v683_v8 = vadd.f32 %v1100_v59, %v682_v4  ;;  %v969_v9 = vmul.f32 -1.442695, %v505_v6 }
 0x1f1   : > { %v1104_v10 = vpop.eup %1103  ;;  %v581_v12 = vadd.f32 1.0, %v1102_v7 }
 0x1f2   : > { %v687_v13 = vsel %vm686_vm11, %v1100_v59, %v683_v8  ;;  %v695_v14 = vmul.f32 %v1104_v10, %v580_v61  ;;  %1105 = vpow2.f32 %v969_v9  ;;  %vm700_vm13 = vweird.f32 %v1104_v10 }
 0x1f3   : > { %v692_v15 = vsel %vm689_vm12, %v691_v11, %v687_v13  ;;  %1107 = vrcp.f32 %v581_v12  ;;  %vm701_vm15 = vmor %vm699_vm14, %vm700_vm13  ;;  %v720_v33 = vand.u32 2147483648, %v581_v12  ;;  %v718_v37 = vand.u32 2147483647, %v581_v12 }
 0x1f4   : > { %835 = vst [vmem:[%s1390_s26 + $0x30] sm:$0xff] %v692_v15  ;;  %v696_v16 = vsub.f32 1.0, %v695_v14  ;;  %vm714_vm2 = vweird.f32 %v581_v12 }
 0x1f5   : > { %v507_v18 = vpop.f32.mrf.mxu2  ;;  %v721_v43 = vor.u32 1.1754944e-38, %v720_v33  ;;  %vm719_vm4 = vcmp.eq.f32.partialorder %v718_v37, 8.507059e+37 }
 0x1f6   : > { %v697_v19 = vmul.f32 %v1104_v10, %v696_v16  ;;  %v508_v21 = vadd.f32 %v1381_v22, %v507_v18 }
 0x1f8   : > { %v1106_v23 = vpop.eup %1105  ;;  %v698_v24 = vadd.f32 %v1104_v10, %v697_v19  ;;  %v970_v25 = vmul.f32 -1.442695, %v508_v21 }
 0x1f9   : > { %v1108_v26 = vpop.eup %1107  ;;  %v582_v28 = vadd.f32 1.0, %v1106_v23 }
 0x1fa   : > { %v702_v29 = vsel %vm701_vm15, %v1104_v10, %v698_v24  ;;  %v710_v30 = vmul.f32 %v1108_v26, %v581_v12  ;;  %1109 = vpow2.f32 %v970_v25  ;;  %vm715_vm1 = vweird.f32 %v1108_v26 }
 0x1fb   : > { %v707_v31 = vsel %vm704_vm0, %v706_v27, %v702_v29  ;;  %1111 = vrcp.f32 %v582_v28  ;;  %vm716_vm3 = vmor %vm714_vm2, %vm715_vm1  ;;  %v735_v36 = vand.u32 2147483648, %v582_v28  ;;  %v733_v50 = vand.u32 2147483647, %v582_v28 }
 0x1fc   : > { %836 = vst [vmem:[%s1390_s26 + $0x38] sm:$0xff] %v707_v31  ;;  %v711_v32 = vsub.f32 1.0, %v710_v30  ;;  %vm729_vm6 = vweird.f32 %v582_v28 }
 0x1fd   : > { %v510_v34 = vpop.f32.mrf.mxu2  ;;  %v736_v54 = vor.u32 1.1754944e-38, %v735_v36  ;;  %vm734_vm8 = vcmp.eq.f32.partialorder %v733_v50, 8.507059e+37 }
 0x1fe   : > { %v712_v35 = vmul.f32 %v1108_v26, %v711_v32  ;;  %v511_v38 = vadd.f32 %v1381_v22, %v510_v34 }
 0x200   : > { %v1110_v39 = vpop.eup %1109  ;;  %v713_v40 = vadd.f32 %v1108_v26, %v712_v35  ;;  %v971_v41 = vmul.f32 -1.442695, %v511_v38 }
 0x201   : > { %v1112_v42 = vpop.eup %1111  ;;  %v583_v44 = vadd.f32 1.0, %v1110_v39 }
 0x202   : > { %v717_v45 = vsel %vm716_vm3, %v1108_v26, %v713_v40  ;;  %v725_v46 = vmul.f32 %v1112_v42, %v582_v28  ;;  %1113 = vpow2.f32 %v971_v41  ;;  %vm730_vm5 = vweird.f32 %v1112_v42 }
 0x203   : > { %v722_v47 = vsel %vm719_vm4, %v721_v43, %v717_v45  ;;  %1115 = vrcp.f32 %v583_v44  ;;  %vm731_vm7 = vmor %vm729_vm6, %vm730_vm5  ;;  %v750_v62 = vand.u32 2147483648, %v583_v44  ;;  %v748_v0 = vand.u32 2147483647, %v583_v44 }
 0x204   : > { %837 = vst [vmem:[%s1390_s26 + $0x40] sm:$0xff] %v722_v47  ;;  %v726_v48 = vsub.f32 1.0, %v725_v46  ;;  %vm744_vm10 = vweird.f32 %v583_v44 }
 0x205   : > { %v751_v4 = vor.u32 1.1754944e-38, %v750_v62  ;;  %vm749_vm12 = vcmp.eq.f32.partialorder %v748_v0, 8.507059e+37 }
 0x206   : > { %v727_v49 = vmul.f32 %v1112_v42, %v726_v48 }
 0x208   : > { %v1114_v51 = vpop.eup %1113  ;;  %v728_v52 = vadd.f32 %v1112_v42, %v727_v49 }
 0x209   : > { %v1116_v53 = vpop.eup %1115  ;;  %v584_v55 = vadd.f32 1.0, %v1114_v51 }
 0x20a   : > { %v732_v56 = vsel %vm731_vm7, %v1112_v42, %v728_v52  ;;  %v740_v57 = vmul.f32 %v1116_v53, %v583_v44  ;;  %vm745_vm9 = vweird.f32 %v1116_v53 }
 0x20b   : > { %v737_v58 = vsel %vm734_vm8, %v736_v54, %v732_v56  ;;  %1117 = vrcp.f32 %v584_v55  ;;  %v513_v59 = vpop.f32.mrf.mxu3  ;;  %vm746_vm11 = vmor %vm744_vm10, %vm745_vm9  ;;  %v765_v11 = vand.u32 2147483648, %v584_v55  ;;  %v763_v14 = vand.u32 2147483647, %v584_v55 }
 0x20c   : > { %838 = vst [vmem:[%s1390_s26 + $0x48] sm:$0xff] %v737_v58  ;;  %v741_v60 = vsub.f32 1.0, %v740_v57  ;;  %v514_v61 = vadd.f32 %v1381_v22, %v513_v59  ;;  %vm759_vm14 = vweird.f32 %v584_v55 }
 0x20d   : > { %v766_v18 = vor.u32 1.1754944e-38, %v765_v11  ;;  %vm764_vm0 = vcmp.eq.f32.partialorder %v763_v14, 8.507059e+37 }
 0x20e   : > { %v742_v63 = vmul.f32 %v1116_v53, %v741_v60  ;;  %v972_v1 = vmul.f32 -1.442695, %v514_v61 }
 0x210   : > { %v743_v2 = vadd.f32 %v1116_v53, %v742_v63  ;;  %1119 = vpow2.f32 %v972_v1 }
 0x211   : > { %v1118_v3 = vpop.eup %1117 }
 0x212   : > { %v747_v5 = vsel %vm746_vm11, %v1116_v53, %v743_v2  ;;  %v755_v6 = vmul.f32 %v1118_v3, %v584_v55  ;;  %vm760_vm13 = vweird.f32 %v1118_v3 }
 0x213   : > { %v752_v7 = vsel %vm749_vm12, %v751_v4, %v747_v5  ;;  %v516_v8 = vpop.f32.mrf.mxu3  ;;  %vm761_vm15 = vmor %vm759_vm14, %vm760_vm13 }
 0x214   : > { %839 = vst [vmem:[%s1390_s26 + $0x50] sm:$0xff] %v752_v7  ;;  %v756_v9 = vsub.f32 1.0, %v755_v6  ;;  %v517_v10 = vadd.f32 %v1381_v22, %v516_v8 }
 0x216   : > { %v1120_v12 = vpop.eup %1119  ;;  %v757_v13 = vmul.f32 %v1118_v3, %v756_v9  ;;  %v973_v15 = vmul.f32 -1.442695, %v517_v10 }
 0x217   : > { %v585_v16 = vadd.f32 1.0, %v1120_v12 }
 0x218   : > { %v758_v17 = vadd.f32 %v1118_v3, %v757_v13  ;;  %1121 = vpow2.f32 %v973_v15 }
 0x219   : > { %1123 = vrcp.f32 %v585_v16  ;;  %v780_v30 = vand.u32 2147483648, %v585_v16  ;;  %v778_v33 = vand.u32 2147483647, %v585_v16  ;;  %vm774_vm2 = vweird.f32 %v585_v16 }
 0x21a   : > { %v762_v19 = vsel %vm761_vm15, %v1118_v3, %v758_v17 }
 0x21b   : > { %v767_v20 = vsel %vm764_vm0, %v766_v18, %v762_v19  ;;  %v519_v21 = vpop.f32.mrf.mxu3  ;;  %v781_v40 = vor.u32 1.1754944e-38, %v780_v30  ;;  %vm779_vm4 = vcmp.eq.f32.partialorder %v778_v33, 8.507059e+37 }
 0x21c   : > { %840 = vst [vmem:[%s1390_s26 + $0x58] sm:$0xff] %v767_v20  ;;  %v520_v23 = vadd.f32 %v1381_v22, %v519_v21 }
 0x21e   : > { %v1122_v24 = vpop.eup %1121  ;;  %v974_v25 = vmul.f32 -1.442695, %v520_v23 }
 0x21f   : > { %v1124_v26 = vpop.eup %1123  ;;  %v586_v27 = vadd.f32 1.0, %v1122_v24 }
 0x220   : > { %v770_v28 = vmul.f32 %v1124_v26, %v585_v16  ;;  %1125 = vpow2.f32 %v974_v25  ;;  %vm775_vm1 = vweird.f32 %v1124_v26 }
 0x221   : > { %1127 = vrcp.f32 %v586_v27  ;;  %vm776_vm3 = vmor %vm774_vm2, %vm775_vm1  ;;  %v795_v46 = vand.u32 2147483648, %v586_v27  ;;  %vm789_vm6 = vweird.f32 %v586_v27 }
 0x222   : > { %v771_v29 = vsub.f32 1.0, %v770_v28 }
 0x223   : > { %v522_v31 = vpop.f32.mrf.mxu3  ;;  %v796_v50 = vor.u32 1.1754944e-38, %v795_v46 }
 0x224   : > { %v772_v32 = vmul.f32 %v1124_v26, %v771_v29  ;;  %v523_v34 = vadd.f32 %v1381_v22, %v522_v31  ;;  %v793_v22 = vand.u32 2147483647, %v586_v27 }
 0x226   : > { %v1126_v35 = vpop.eup %1125  ;;  %v773_v37 = vadd.f32 %v1124_v26, %v772_v32  ;;  %v975_v38 = vmul.f32 -1.442695, %v523_v34  ;;  %vm794_vm8 = vcmp.eq.f32.partialorder %v793_v22, 8.507059e+37 }
 0x227   : > { %v1128_v39 = vpop.eup %1127  ;;  %v587_v41 = vadd.f32 1.0, %v1126_v35 }
 0x228   : > { %v777_v42 = vsel %vm776_vm3, %v1124_v26, %v773_v37  ;;  %v785_v43 = vmul.f32 %v1128_v39, %v586_v27  ;;  %1129 = vpow2.f32 %v975_v38  ;;  %vm790_vm5 = vweird.f32 %v1128_v39 }
 0x229   : > { %v782_v44 = vsel %vm779_vm4, %v781_v40, %v777_v42  ;;  %1131 = vrcp.f32 %v587_v41  ;;  %vm791_vm7 = vmor %vm789_vm6, %vm790_vm5  ;;  %v810_v56 = vand.u32 2147483648, %v587_v41  ;;  %v808_v58 = vand.u32 2147483647, %v587_v41 }
 0x22a   : > { %841 = vst [vmem:[%s1390_s26 + $0x60] sm:$0xff] %v782_v44  ;;  %v786_v45 = vsub.f32 1.0, %v785_v43  ;;  %vm804_vm10 = vweird.f32 %v587_v41 }
 0x22b   : > { %v811_v61 = vor.u32 1.1754944e-38, %v810_v56  ;;  %vm809_vm12 = vcmp.eq.f32.partialorder %v808_v58, 8.507059e+37 }
 0x22c   : > { %v787_v47 = vmul.f32 %v1128_v39, %v786_v45 }
 0x22e   : > { %v1130_v48 = vpop.eup %1129  ;;  %v788_v36 = vadd.f32 %v1128_v39, %v787_v47 }
 0x22f   : > { %v1132_v49 = vpop.eup %1131  ;;  %v588_v51 = vadd.f32 1.0, %v1130_v48 }
 0x230   : > { %v792_v52 = vsel %vm791_vm7, %v1128_v39, %v788_v36  ;;  %v800_v53 = vmul.f32 %v1132_v49, %v587_v41  ;;  %vm805_vm9 = vweird.f32 %v1132_v49 }
 0x231   : > { %v797_v54 = vsel %vm794_vm8, %v796_v50, %v792_v52  ;;  %1133 = vrcp.f32 %v588_v51  ;;  %vm806_vm11 = vmor %vm804_vm10, %vm805_vm9  ;;  %v825_v2 = vand.u32 2147483648, %v588_v51  ;;  %v823_v4 = vand.u32 2147483647, %v588_v51 }
 0x232   : > { %842 = vst [vmem:[%s1390_s26 + $0x68] sm:$0xff] %v797_v54  ;;  %v801_v55 = vsub.f32 1.0, %v800_v53  ;;  %vm819_vm14 = vweird.f32 %v588_v51 }
 0x233   : > { %v826_v6 = vor.u32 1.1754944e-38, %v825_v2  ;;  %vm824_vm0 = vcmp.eq.f32.partialorder %v823_v4, 8.507059e+37 }
 0x234   : > { %v802_v57 = vmul.f32 %v1132_v49, %v801_v55 }
 0x236   : > { %v803_v59 = vadd.f32 %v1132_v49, %v802_v57 }
 0x237   : > { %v1134_v60 = vpop.eup %1133 }
 0x238   : > { %v807_v62 = vsel %vm806_vm11, %v1132_v49, %v803_v59  ;;  %v815_v63 = vmul.f32 %v1134_v60, %v588_v51  ;;  %vm820_vm13 = vweird.f32 %v1134_v60 }
 0x239   : > { %v812_v0 = vsel %vm809_vm12, %v811_v61, %v807_v62  ;;  %vm821_vm15 = vmor %vm819_vm14, %vm820_vm13 }
 0x23a   : > { %843 = vst [vmem:[%s1390_s26 + $0x70] sm:$0xff] %v812_v0  ;;  %v816_v1 = vsub.f32 1.0, %v815_v63 }
 0x23c   : > { %v817_v3 = vmul.f32 %v1134_v60, %v816_v1 }
 0x23e   : > { %v818_v5 = vadd.f32 %v1134_v60, %v817_v3 }
 0x240   : > { %v822_v7 = vsel %vm821_vm15, %v1134_v60, %v818_v5 }
 0x241   : > { %v827_v8 = vsel %vm824_vm0, %v826_v6, %v822_v7 }
 0x242   : > { %844 = vst [vmem:[%s1390_s26 + $0x78] sm:$0xff] %v827_v8 }
 0x243   : > { %1192 = shalt.err (!%p1189_p8)
}
 0x244   : > { %s1236_s19 = smov 128   ;;  %s1237_s20 = smov 8  }
 0x245   : > { %1018 = dma.vmem_to_hbm [thread:$0]  (%p1296_p5), %s859_s16, 2048, %s861_s4, %s846_s5, %s1236_s19, %s1236_s19, %s1237_s20  }
 0x246 PF: > { %p1030_p9 = scmp.ge.s32.totalorder %s1231_s15, 2  ;;  %s875_s24 = sand.u32 1, %s1219_s12  }
 0x247   : > { %s876_s25 = scalar_lea.sflag [#allocation4], %s875_s24 }
 0x248   : > { %p1025_p10 = pnand %p1030_p9, %p1300_p6 }
 0x24a   : > { %p1026_p11 = pneg %p1025_p10 }
 0x24c   : > { %1214 = dma.done.wait (%p1026_p11), %s876_s25, 2048  }
 0x24d   : > { %1216 = vsyncadd (%p1026_p11), %s876_s25, 4294965248  ;;  %p14_p12 = scmp.ge.s32.totalorder %s1283_s18, 4   ;;  %s1460_s12 = smov %s1223_s13 }
 0x24e   : > { %s1461_s13 = smov %s1227_s14  ;;  %s1462_s14 = smov %s1294_s21 }
 0x24f   : > { %s1463_s15 = smov %s1283_s18  ;;  %16 = sbr.rel (!%p14_p12) target bundleno = 4 (0x4), region = 74 }
 0x254   :  { %882 = vsyncpa [#allocation3], 1 }
 0x255   :  { %884 = vsyncpa [#allocation3 + $0x1], 1 }
 0x256   :  { %885 = vsyncpa [#allocation4], 1 }
 0x257   :  { %887 = vsyncpa [#allocation4 + $0x1], 1 }

</bundles_post_ra>
